<compile_context>
chip_gen: v7x
topology: tpu7x:2x2x1
jax: 0.10.0
libtpu: 0.0.40
codegen_flags: <defaults>
</compile_context>

<pallas_src>
import math

import jax
import jax.numpy as jnp
from jax.experimental import pallas as pl
from jax.experimental.pallas import tpu as pltpu

_LANE = 128               # lane-dense last dim (one full vreg lane width)
_MAX_TILE_ROWS = 8192     # (8192, 128) f32 tile = 4 MiB per buffer
_SINGLE_BLOCK_ROWS = 256  # below this, a single full-extent block is fine


def _kl_div_none_kernel(x_ref, y_ref, o_ref):
    x = x_ref[...]          # log-probabilities (input)
    y = y_ref[...]          # probabilities (target)
    # Sanitized log: never evaluate log on non-positive (or garbage OOB)
    # values; entries with y <= 0 contribute exactly 0, matching
    # aten.kl_div(reduction='none', log_target=False).
    log_y = jnp.log(jnp.where(y > 0, y, jnp.ones_like(y)))
    val = y * (log_y - x)
    o_ref[...] = jnp.where(y > 0, val, jnp.zeros_like(val))


def kl_div_reduction_none(x: jax.Array, y: jax.Array) -> jax.Array:
    assert x.shape == y.shape
    assert x.dtype == jnp.float32 and y.dtype == jnp.float32

    orig_shape = x.shape
    total = math.prod(orig_shape) if orig_shape else 1
    if total == 0:  # empty input: nothing to compute
        return jnp.zeros(orig_shape, jnp.float32)

    rows = -(-total // _LANE)
    padded = rows * _LANE

    def to_2d(a):
        flat = a.reshape(-1)
        if padded != total:
            # Only the unaligned-tail case pays a pad copy (<=127 elements of
            # zeros appended; padded y == 0 -> padded output == 0, no NaNs).
            flat = jnp.pad(flat, (0, padded - total))
        return flat.reshape(rows, _LANE)

    x2 = to_2d(x)
    y2 = to_2d(y)

    if rows <= _SINGLE_BLOCK_ROWS:
        # Tiny input: one full-extent block, no (8,128) divisibility issue.
        tile_rows = rows
    else:
        # At least 2 programs so ("parallel",) can shard across both
        # TensorCores on v7x; cap per-buffer size; keep sublane multiple of 8.
        tile_rows = min(_MAX_TILE_ROWS, -(-rows // 2))
        tile_rows = -(-tile_rows // 8) * 8

    grid = pl.cdiv(rows, tile_rows)   # partial trailing block is allowed
    spec = pl.BlockSpec((tile_rows, _LANE), lambda i: (i, 0))

    out2 = pl.pallas_call(
        _kl_div_none_kernel,
        out_shape=jax.ShapeDtypeStruct((rows, _LANE), jnp.float32),
        grid=(grid,),
        in_specs=[spec, spec],
        out_specs=spec,
        compiler_params=pltpu.CompilerParams(
            dimension_semantics=("parallel",),   # megacore sharding on v7x
            vmem_limit_bytes=32 * 1024 * 1024),  # 3 ops x 2 bufs x 4 MiB fits
        cost_estimate=pl.CostEstimate(
            flops=3 * padded,
            transcendentals=padded,
            bytes_accessed=12 * padded),
    )(x2, y2)

    if padded == total:
        # Pure reshape (no extra HBM pass) for the common aligned case.
        return out2.reshape(orig_shape)
    return out2.reshape(-1)[:total].reshape(orig_shape)


def _reference(x, y):
    log_y = jnp.log(jnp.where(y > 0, y, 1.0))
    val = y * (log_y - x)
    return jnp.where(y > 0, val, jnp.zeros_like(val))


if __name__ == "__main__":
    key = jax.random.PRNGKey(0)
    kx, ky = jax.random.split(key)

    B, C, N = 2, 4, 16  # matches the module's 3-D (-1,-1,-1) float32 inputs

    # x: log-probabilities, y: probabilities (typical kl_div usage).
    x = jax.nn.log_softmax(
        jax.random.normal(kx, (B, C, N), dtype=jnp.float32), axis=-1)
    y = jax.nn.softmax(
        jax.random.normal(ky, (B, C, N), dtype=jnp.float32), axis=-1)
    # Include some exact zeros in the target to exercise the y<=0 -> 0 branch.
    y = y.at[0, 0, :4].set(0.0)

    out = jax.block_until_ready(kl_div_reduction_none(x, y))

    ref = _reference(x, y)
    assert out.shape == (B, C, N) and out.dtype == jnp.float32
    assert jnp.allclose(out, ref, atol=1e-6, rtol=1e-6)

    print("KERNEL_OK")
</pallas_src>

<mosaic_0001>
module attributes {stable_mosaic.version = 11 : i64} {
  func.func @_kl_div_none_kernel(%arg0: i32, %arg1: memref<1x128xf32, #tpu.memory_space<vmem>>, %arg2: memref<1x128xf32, #tpu.memory_space<vmem>>, %arg3: memref<1x128xf32, #tpu.memory_space<vmem>>) attributes {dimension_semantics = [#tpu.dimension_semantics<parallel>], iteration_bounds = array<i64: 1>, scalar_prefetch = 0 : i64, scratch_operands = 0 : i64, tpu.core_type = #tpu.core_type<tc>, window_params = [{transform_indices = @transform_0, window_bounds = array<i64: 1, 128>}, {transform_indices = @transform_1, window_bounds = array<i64: 1, 128>}, {transform_indices = @transform_2, window_bounds = array<i64: 1, 128>}]} {
    %c0 = arith.constant 0 : index
    %c0_0 = arith.constant 0 : index
    %0 = vector.load %arg1[%c0, %c0_0] : memref<1x128xf32, #tpu.memory_space<vmem>>, vector<1x128xf32>
    %c0_1 = arith.constant 0 : index
    %c0_2 = arith.constant 0 : index
    %1 = vector.load %arg2[%c0_1, %c0_2] : memref<1x128xf32, #tpu.memory_space<vmem>>, vector<1x128xf32>
    %cst = arith.constant 0.000000e+00 : f32
    %2 = vector.broadcast %cst : f32 to vector<1x128xf32>
    %3 = arith.cmpf ogt, %1, %2 : vector<1x128xf32>
    %cst_3 = arith.constant 1.000000e+00 : f32
    %4 = vector.broadcast %cst_3 : f32 to vector<1x128xf32>
    %5 = arith.select %3, %1, %4 : vector<1x128xi1>, vector<1x128xf32>
    %6 = math.log %5 : vector<1x128xf32>
    %7 = arith.subf %6, %0 : vector<1x128xf32>
    %8 = arith.mulf %1, %7 : vector<1x128xf32>
    %cst_4 = arith.constant 0.000000e+00 : f32
    %9 = vector.broadcast %cst_4 : f32 to vector<1x128xf32>
    %10 = arith.cmpf ogt, %1, %9 : vector<1x128xf32>
    %cst_5 = arith.constant 0.000000e+00 : f32
    %11 = vector.broadcast %cst_5 : f32 to vector<1x128xf32>
    %12 = arith.select %10, %8, %11 : vector<1x128xi1>, vector<1x128xf32>
    %c0_6 = arith.constant 0 : index
    %c0_7 = arith.constant 0 : index
    %13 = vector.load %arg3[%c0_6, %c0_7] : memref<1x128xf32, #tpu.memory_space<vmem>>, vector<1x128xf32>
    tpu.vector_store %arg3[%c0_6, %c0_7], %12 {strides = array<i32>} : memref<1x128xf32, #tpu.memory_space<vmem>>, vector<1x128xf32>,
    return
  }
  func.func @transform_0(%arg0: i32) -> (i32, i32) {
    %c0_i32 = arith.constant 0 : i32
    %c0_i32_0 = arith.constant 0 : i32
    return %arg0, %c0_i32 : i32, i32
  }
  func.func @transform_1(%arg0: i32) -> (i32, i32) {
    %c0_i32 = arith.constant 0 : i32
    %c0_i32_0 = arith.constant 0 : i32
    return %arg0, %c0_i32 : i32, i32
  }
  func.func @transform_2(%arg0: i32) -> (i32, i32) {
    %c0_i32 = arith.constant 0 : i32
    %c0_i32_0 = arith.constant 0 : i32
    return %arg0, %c0_i32 : i32, i32
  }
}

</mosaic_0001>

<bundles_post_ra>
// kernel: tpu_custom_call.1
= control target key start
LH: loop header
LB: loop body
LE: loop exit
PB: predicated region body
PF: predicated region fallthrough
CT: control target
= control target key end

     0   :  { %7 = vsyncpa [#allocation3], 0  ;;  %s145_s0 = inlined_call_operand.hbm [shape: f32[1,128], index: 0, kind: input, shape index: {}]   ;;  %s146_s1 = inlined_call_operand.vmem [shape: f32[1,128], index: 1, kind: input, shape index: {}]   ;;  %s147_s2 = inlined_call_operand.hbm [shape: f32[1,128], index: 2, kind: output, shape index: {}]  }
   0x1   :  { %8 = vsyncpa [#allocation4], 0  ;;  %s101_s9 = smov [#allocation2]   ;;  %s53_s13 = scalar_lea.hbm %s145_s0, 16 }
   0x2   :  { %s15_s10 = sshll.u32 %s101_s9, 4  ;;  %p54_p0 = scmp.ne.s32.totalorder %s145_s0, %s53_s13  ;;  %s16_s10 = int_to_ptr.vmem [resolvable:$true] %s15_s10 }
   0x3   :  { %p57_p1 = scmp.lt.u32.totalorder %s53_s13, %s145_s0 }
   0x5   :  { %p59_p2 = pnand %p57_p1, %p54_p0 }
   0x7   :  { %62 = shalt.err (!%p59_p2)
}
   0x8   :  { %s63_s18 = scalar_lea.vmem %s16_s10, 16  ;;  %s67_s19 = scalar_lea.vmem %s16_s10, 32 }
   0x9   :  { %p64_p3 = scmp.ne.s32.totalorder %s16_s10, %s63_s18  ;;  %p68_p4 = scmp.lt.s32.totalorder %s16_s10, %s16_s10 }
   0xa   :  { %p69_p5 = scmp.lt.s32.totalorder %s67_s19, %s63_s18 }
   0xc   :  { %p70_p6 = por %p69_p5, %p68_p4 }
   0xe   :  { %p71_p7 = pnand %p70_p6, %p64_p3 }
  0x10   :  { %74 = shalt.err (!%p71_p7)
}
  0x11   :  { %18 = dma.hbm_to_vmem [thread:$0]  %s145_s0, 16, %s16_s10, [#allocation3]  }
  0x12   :  { %97 = dma.done.wait [#allocation3], 16  }
  0x13   :  { %98 = vsyncadd [#allocation3], 4294967280  ;;  %v25_v0 = vld [vmem:[%s146_s1] sm:$0x1]  ;;  %s102_s24 = smov [#allocation5]  }
  0x14   :  { %vm26_vm0 = vcmp.gt.f32.partialorder %v25_v0, 0.0  ;;  %v24_v3 = vld [vmem:[#allocation2] sm:$0x1]  ;;  %s40_s25 = sshll.u32 %s102_s24, 4  ;;  %s41_s25 = int_to_ptr.vmem [resolvable:$true] %s40_s25 }
  0x15   :  { %v27_v1 = vsel %vm26_vm0, %v25_v0, 1.0  ;;  %s75_s0 = scalar_lea.vmem %s41_s25, 16  ;;  %s79_s26 = scalar_lea.vmem %s41_s25, 32 }
  0x16   :  { %51 = vlog2.f32 %v27_v1  ;;  %p76_p8 = scmp.ne.s32.totalorder %s41_s25, %s75_s0  ;;  %p80_p9 = scmp.lt.s32.totalorder %s41_s25, %s41_s25 }
  0x17   :  { %p81_p10 = scmp.lt.s32.totalorder %s79_s26, %s75_s0 }
  0x19   :  { %p82_p11 = por %p81_p10, %p80_p9 }
  0x1b   :  { %p83_p12 = pnand %p82_p11, %p76_p8 }
  0x20   :  { %v52_v2 = vpop.eup %51 }
  0x21   :  { %v29_v4 = vmul.f32 0.6931472, %v52_v2 }
  0x23   :  { %v30_v5 = vsub.f32 %v29_v4, %v24_v3 }
  0x25   :  { %v31_v6 = vmul.f32 %v30_v5, %v25_v0 }
  0x27   :  { %v32_v7 = vsel %vm26_vm0, %v31_v6, 0.0 }
  0x28   :  { %33 = vst [vmem:[#allocation5] sm:$0x1] %v32_v7 }
  0x29   :  { %86 = shalt.err (!%p83_p12)
}
  0x2a   :  { %s87_s28 = scalar_lea.hbm %s147_s2, 16 }
  0x2b   :  { %p88_p13 = scmp.ne.s32.totalorder %s147_s2, %s87_s28  ;;  %p91_p0 = scmp.lt.u32.totalorder %s87_s28, %s147_s2 }
  0x2d   :  { %p93_p1 = pnand %p91_p0, %p88_p13 }
  0x2f   :  { %96 = shalt.err (!%p93_p1)
}
  0x30   :  { %43 = dma.vmem_to_hbm [thread:$0]  %s41_s25, 16, %s147_s2, [#allocation4]  }
  0x31   :  { %99 = dma.done.wait [#allocation4], 16  }
  0x32   :  { %100 = vsyncadd [#allocation4], 4294967280 }
  0x33   :  { %47 = vsyncpa [#allocation3], 1 }
  0x34   :  { %48 = vsyncpa [#allocation4], 1 }

</bundles_post_ra>
